<compile_context>
chip_gen: v7x
topology: tpu7x:2x2x1
jax: 0.10.0
libtpu: 0.0.40
codegen_flags: <defaults>
</compile_context>

<pallas_src>
import functools
import numpy as np
import jax
import jax.numpy as jnp
from jax.experimental import pallas as pl
from jax.experimental.pallas import tpu as pltpu

LN_EPS = 1e-5  # torch.nn.LayerNorm default


# ---------------------------------------------------------------------------
# Pallas kernel: fused 1x1 conv (channel matmul) + bias + per-pixel LayerNorm
# ---------------------------------------------------------------------------
def pwconv_ln_kernel(x_ref, w_ref, b_ref, g_ref, bt_ref, o_ref):
    # x_ref block: (1, Cin, TP) f32 ; w_ref: (Cout, Cin) bf16
    # b/g/bt refs: (Cout, 1) f32   ; o_ref block: (1, Cout, TP) f32
    x = x_ref[0]                                   # (Cin, TP) f32
    # 1x1 conv == channel matmul; bf16 operands, f32 accumulation on the MXU.
    y = jnp.dot(w_ref[...], x.astype(jnp.bfloat16),
                preferred_element_type=jnp.float32)            # (Cout, TP)
    y = y + b_ref[...]                                         # conv bias

    # LayerNorm over the channel (sublane) axis, per pixel (lane column).
    mu = jnp.mean(y, axis=0, keepdims=True)                    # (1, TP)
    var = jnp.mean((y - mu) * (y - mu), axis=0, keepdims=True)
    yn = (y - mu) * jax.lax.rsqrt(var + LN_EPS)                # rsqrt -> EUP
    o_ref[0] = (yn * g_ref[...] + bt_ref[...]).astype(o_ref.dtype)


# ---------------------------------------------------------------------------
# tile-size helper: lane-dense spatial tiles (multiples of 128)
# ---------------------------------------------------------------------------
def _choose_tile(P, max_tile=512):
    """Returns (TP, Ppad): spatial tile size and (possibly padded) spatial extent."""
    if P % 128 == 0:
        tp = 128
        t = 128
        while t <= min(P, max_tile):
            if P % t == 0:
                tp = t
            t += 128
        return tp, P
    # pad spatial dim up to a multiple of 128; padded pixels are independent
    # under per-pixel LayerNorm and are sliced off afterwards.
    p_pad = ((P + 127) // 128) * 128
    return 128, p_pad


# ---------------------------------------------------------------------------
# wrapper: full pointwise_conv.forward
# ---------------------------------------------------------------------------
def pointwise_conv_ln(x_nchw, w, b, gamma, beta, *, max_tile=512):
    """x_nchw: (B, Cin, H, W) f32; w: (Cout, Cin); b/gamma/beta: (Cout,).
    Returns (B, Cout, H, W) f32, matching pointwise_conv.forward."""
    B, Cin, H, W = x_nchw.shape
    Cout = w.shape[0]
    P = H * W

    x3 = x_nchw.reshape(B, Cin, P).astype(jnp.float32)   # free reshape (NCHW kept)
    TP, Ppad = _choose_tile(P, max_tile)
    if Ppad != P:
        x3 = jnp.pad(x3, ((0, 0), (0, 0), (0, Ppad - P)))

    w_bf16 = w.astype(jnp.bfloat16)                       # MXU-native operand
    b2 = b.reshape(Cout, 1).astype(jnp.float32)
    g2 = gamma.reshape(Cout, 1).astype(jnp.float32)
    bt2 = beta.reshape(Cout, 1).astype(jnp.float32)

    grid = (B, Ppad // TP)
    const = lambda shape: pl.BlockSpec(shape, lambda bb, pp: (0, 0))

    out = pl.pallas_call(
        pwconv_ln_kernel,
        out_shape=jax.ShapeDtypeStruct((B, Cout, Ppad), jnp.float32),
        grid=grid,
        in_specs=[
            pl.BlockSpec((1, Cin, TP), lambda bb, pp: (bb, 0, pp)),  # x tile
            const((Cout, Cin)),                                      # conv weight
            const((Cout, 1)),                                        # conv bias
            const((Cout, 1)),                                        # LN gamma
            const((Cout, 1)),                                        # LN beta
        ],
        out_specs=pl.BlockSpec((1, Cout, TP), lambda bb, pp: (bb, 0, pp)),
        compiler_params=pltpu.CompilerParams(
            dimension_semantics=("parallel", "parallel")),
    )(x3, w_bf16, b2, g2, bt2)

    if Ppad != P:
        out = out[:, :, :P]
    return out.reshape(B, Cout, H, W)


# ---------------------------------------------------------------------------
# pure-JAX reference (mirrors the PyTorch module math) for validation
# ---------------------------------------------------------------------------
def reference_forward(x_nchw, w, b, gamma, beta, *, matmul_dtype=jnp.float32):
    B, Cin, H, W = x_nchw.shape
    Cout = w.shape[0]
    # 1x1 conv == per-pixel linear in channels-last view
    xt = jnp.transpose(x_nchw, (0, 2, 3, 1)).reshape(B, H * W, Cin)
    y = jnp.dot(xt.astype(matmul_dtype), w.T.astype(matmul_dtype),
                preferred_element_type=jnp.float32) + b
    # LayerNorm over channels (biased variance, eps=1e-5, like torch)
    mu = jnp.mean(y, axis=-1, keepdims=True)
    var = jnp.mean((y - mu) ** 2, axis=-1, keepdims=True)
    yn = (y - mu) * jax.lax.rsqrt(var + LN_EPS) * gamma + beta
    return jnp.transpose(yn.reshape(B, H, W, Cout), (0, 3, 1, 2))


# ---------------------------------------------------------------------------
# self-test
# ---------------------------------------------------------------------------
if __name__ == "__main__":
    key = jax.random.PRNGKey(0)
    kx, kw, kb, kg, kbt = jax.random.split(key, 5)

    B, Cin, H, W = 2, 32, 16, 16      # nin=32, spatial 16x16
    Cout = 128                        # nout=128 (lane/MXU friendly)

    x = jax.random.normal(kx, (B, Cin, H, W), jnp.float32)
    w = 0.1 * jax.random.normal(kw, (Cout, Cin), jnp.float32)
    b = 0.1 * jax.random.normal(kb, (Cout,), jnp.float32)
    gamma = jnp.ones((Cout,), jnp.float32) + 0.05 * jax.random.normal(kg, (Cout,), jnp.float32)
    beta = 0.05 * jax.random.normal(kbt, (Cout,), jnp.float32)

    out = pointwise_conv_ln(x, w, b, gamma, beta)
    out = jax.block_until_ready(out)

    # 1) strict check vs a reference using the same bf16-operand / f32-accum matmul
    ref_match = reference_forward(x, w, b, gamma, beta, matmul_dtype=jnp.bfloat16)
    np.testing.assert_allclose(np.asarray(out), np.asarray(ref_match),
                               rtol=1e-3, atol=1e-3)

    # 2) loose sanity check vs the fully-f32 (PyTorch-faithful) reference;
    #    slack covers the bf16 rounding of the MXU operands.
    ref_f32 = reference_forward(x, w, b, gamma, beta, matmul_dtype=jnp.float32)
    np.testing.assert_allclose(np.asarray(out), np.asarray(ref_f32),
                               rtol=5e-2, atol=5e-2)

    print("KERNEL_OK")
</pallas_src>

<mosaic_0001>
module attributes {stable_mosaic.version = 11 : i64} {
  func.func @pwconv_ln_kernel(%arg0: i32, %arg1: i32, %arg2: memref<1x32x256xf32, #tpu.memory_space<vmem>>, %arg3: memref<128x32xbf16, #tpu.memory_space<vmem>>, %arg4: memref<128x1xf32, #tpu.memory_space<vmem>>, %arg5: memref<128x1xf32, #tpu.memory_space<vmem>>, %arg6: memref<128x1xf32, #tpu.memory_space<vmem>>, %arg7: memref<1x128x256xf32, #tpu.memory_space<vmem>>) attributes {dimension_semantics = [#tpu.dimension_semantics<parallel>, #tpu.dimension_semantics<parallel>], iteration_bounds = array<i64: 2, 1>, scalar_prefetch = 0 : i64, scratch_operands = 0 : i64, tpu.core_type = #tpu.core_type<tc>, window_params = [{transform_indices = @transform_0, window_bounds = array<i64: 1, 32, 256>}, {pipeline_mode = #tpu.pipeline_mode<synchronous>, transform_indices = @transform_1, window_bounds = array<i64: 128, 32>}, {pipeline_mode = #tpu.pipeline_mode<synchronous>, transform_indices = @transform_2, window_bounds = array<i64: 128, 1>}, {pipeline_mode = #tpu.pipeline_mode<synchronous>, transform_indices = @transform_3, window_bounds = array<i64: 128, 1>}, {pipeline_mode = #tpu.pipeline_mode<synchronous>, transform_indices = @transform_4, window_bounds = array<i64: 128, 1>}, {transform_indices = @transform_5, window_bounds = array<i64: 1, 128, 256>}]} {
    %c0 = arith.constant 0 : index
    %c0_0 = arith.constant 0 : index
    %c0_1 = arith.constant 0 : index
    %0 = vector.load %arg2[%c0, %c0_0, %c0_1] : memref<1x32x256xf32, #tpu.memory_space<vmem>>, vector<1x32x256xf32>
    %1 = vector.shape_cast %0 : vector<1x32x256xf32> to vector<32x256xf32>
    %c0_2 = arith.constant 0 : index
    %c0_3 = arith.constant 0 : index
    %2 = vector.load %arg3[%c0_2, %c0_3] : memref<128x32xbf16, #tpu.memory_space<vmem>>, vector<128x32xbf16>
    %3 = arith.truncf %1 : vector<32x256xf32> to vector<32x256xbf16>
    %cst = arith.constant dense<0.000000e+00> : vector<128x256xf32>
    %4 = tpu.matmul %2, %3, %cst {dimension_numbers = #tpu.dot_dimension_numbers<[1], [0], [0], [1], [0, 0, 1, 1], [], []>} : vector<128x32xbf16>, vector<32x256xbf16>, vector<128x256xf32> -> vector<128x256xf32>
    %c0_4 = arith.constant 0 : index
    %c0_5 = arith.constant 0 : index
    %5 = vector.load %arg4[%c0_4, %c0_5] : memref<128x1xf32, #tpu.memory_space<vmem>>, vector<128x1xf32>
    %6 = vector.broadcast %5 : vector<128x1xf32> to vector<128x256xf32>
    %7 = arith.addf %4, %6 : vector<128x256xf32>
    %cst_6 = arith.constant dense<0.000000e+00> : vector<256xf32>
    %8 = vector.multi_reduction <add>, %7, %cst_6 [0] : vector<128x256xf32> to vector<256xf32>
    %9 = vector.shape_cast %8 : vector<256xf32> to vector<1x256xf32>
    %cst_7 = arith.constant 1.280000e+02 : f32
    %10 = vector.broadcast %cst_7 : f32 to vector<1x256xf32>
    %11 = arith.divf %9, %10 : vector<1x256xf32>
    %12 = vector.broadcast %11 : vector<1x256xf32> to vector<128x256xf32>
    %13 = arith.subf %7, %12 : vector<128x256xf32>
    %14 = vector.broadcast %11 : vector<1x256xf32> to vector<128x256xf32>
    %15 = arith.subf %7, %14 : vector<128x256xf32>
    %16 = arith.mulf %13, %15 : vector<128x256xf32>
    %cst_8 = arith.constant dense<0.000000e+00> : vector<256xf32>
    %17 = vector.multi_reduction <add>, %16, %cst_8 [0] : vector<128x256xf32> to vector<256xf32>
    %18 = vector.shape_cast %17 : vector<256xf32> to vector<1x256xf32>
    %cst_9 = arith.constant 1.280000e+02 : f32
    %19 = vector.broadcast %cst_9 : f32 to vector<1x256xf32>
    %20 = arith.divf %18, %19 : vector<1x256xf32>
    %21 = vector.broadcast %11 : vector<1x256xf32> to vector<128x256xf32>
    %22 = arith.subf %7, %21 : vector<128x256xf32>
    %cst_10 = arith.constant 9.99999974E-6 : f32
    %23 = vector.broadcast %cst_10 : f32 to vector<1x256xf32>
    %24 = arith.addf %20, %23 : vector<1x256xf32>
    %25 = math.rsqrt %24 : vector<1x256xf32>
    %26 = vector.broadcast %25 : vector<1x256xf32> to vector<128x256xf32>
    %27 = arith.mulf %22, %26 : vector<128x256xf32>
    %c0_11 = arith.constant 0 : index
    %c0_12 = arith.constant 0 : index
    %28 = vector.load %arg5[%c0_11, %c0_12] : memref<128x1xf32, #tpu.memory_space<vmem>>, vector<128x1xf32>
    %29 = vector.broadcast %28 : vector<128x1xf32> to vector<128x256xf32>
    %30 = arith.mulf %27, %29 : vector<128x256xf32>
    %c0_13 = arith.constant 0 : index
    %c0_14 = arith.constant 0 : index
    %31 = vector.load %arg6[%c0_13, %c0_14] : memref<128x1xf32, #tpu.memory_space<vmem>>, vector<128x1xf32>
    %32 = vector.broadcast %31 : vector<128x1xf32> to vector<128x256xf32>
    %33 = arith.addf %30, %32 : vector<128x256xf32>
    %c0_15 = arith.constant 0 : index
    %c0_16 = arith.constant 0 : index
    %c0_17 = arith.constant 0 : index
    %34 = vector.load %arg7[%c0_15, %c0_16, %c0_17] : memref<1x128x256xf32, #tpu.memory_space<vmem>>, vector<1x128x256xf32>
    %35 = vector.shape_cast %34 : vector<1x128x256xf32> to vector<128x256xf32>
    %36 = vector.shape_cast %33 : vector<128x256xf32> to vector<1x128x256xf32>
    tpu.vector_store %arg7[%c0_15, %c0_16, %c0_17], %36 {strides = array<i32>} : memref<1x128x256xf32, #tpu.memory_space<vmem>>, vector<1x128x256xf32>,
    return
  }
  func.func @transform_0(%arg0: i32, %arg1: i32) -> (i32, i32, i32) {
    %c0_i32 = arith.constant 0 : i32
    %c0_i32_0 = arith.constant 0 : i32
    return %arg0, %c0_i32, %arg1 : i32, i32, i32
  }
  func.func @transform_1(%arg0: i32, %arg1: i32) -> (i32, i32) {
    %c0_i32 = arith.constant 0 : i32
    %c0_i32_0 = arith.constant 0 : i32
    %c0_i32_1 = arith.constant 0 : i32
    return %c0_i32, %c0_i32_0 : i32, i32
  }
  func.func @transform_2(%arg0: i32, %arg1: i32) -> (i32, i32) {
    %c0_i32 = arith.constant 0 : i32
    %c0_i32_0 = arith.constant 0 : i32
    %c0_i32_1 = arith.constant 0 : i32
    return %c0_i32, %c0_i32_0 : i32, i32
  }
  func.func @transform_3(%arg0: i32, %arg1: i32) -> (i32, i32) {
    %c0_i32 = arith.constant 0 : i32
    %c0_i32_0 = arith.constant 0 : i32
    %c0_i32_1 = arith.constant 0 : i32
    return %c0_i32, %c0_i32_0 : i32, i32
  }
  func.func @transform_4(%arg0: i32, %arg1: i32) -> (i32, i32) {
    %c0_i32 = arith.constant 0 : i32
    %c0_i32_0 = arith.constant 0 : i32
    %c0_i32_1 = arith.constant 0 : i32
    return %c0_i32, %c0_i32_0 : i32, i32
  }
  func.func @transform_5(%arg0: i32, %arg1: i32) -> (i32, i32, i32) {
    %c0_i32 = arith.constant 0 : i32
    %c0_i32_0 = arith.constant 0 : i32
    return %arg0, %c0_i32, %arg1 : i32, i32, i32
  }
}

</mosaic_0001>

<bundles_post_ra>
// kernel: tpu_custom_call.1
= control target key start
LH: loop header
LB: loop body
LE: loop exit
PB: predicated region body
PF: predicated region fallthrough
CT: control target
= control target key end

     0   :  { %10 = vsyncpa [#allocation3], 0  ;;  %s2093_s0 = inlined_call_operand.vmem [shape: f32[2,32,256], index: 0, kind: input, shape index: {}]   ;;  %s2094_s1 = inlined_call_operand.vmem [shape: bf16[128,32], index: 1, kind: input, shape index: {}]   ;;  %s2095_s2 = inlined_call_operand.vmem [shape: f32[128,1], index: 2, kind: input, shape index: {}]   ;;  %s2096_s3 = inlined_call_operand.vmem [shape: f32[128,1], index: 3, kind: input, shape index: {}]   ;;  %s2097_s4 = inlined_call_operand.vmem [shape: f32[128,1], index: 4, kind: input, shape index: {}]   ;;  %s2098_s5 = inlined_call_operand.hbm [shape: f32[2,128,256], index: 5, kind: output, shape index: {}]  }
   0x1   :  { %12 = vsyncpa [#allocation3 + $0x1], 0  ;;  %s1350_s18 = smov 0   ;;  %s1352_s19 = smov 0  }
   0x2   :  { %s1354_s20 = smov 0   ;;  %s1356_s21 = smov 0  }
   0x3   :  { %s1358_s22 = smov 0   ;;  %s1360_s23 = smov 0  }
   0x4 LB: > { %s1129_s24 = sadd.s32 4294967295, %s1314_s23   ;;  %s1130_s25 = sadd.s32 4294967294, %s1314_s23   ;;  %s1314_s23 = sphi %s1360_s23, %s18_s23   ;;  %s1310_s22 = sphi %s1358_s22, %s2132_s22   ;;  %s1306_s21 = sphi %s1356_s21, %s2131_s21   ;;  %s1302_s20 = sphi %s1354_s20, %s2130_s20   ;;  %s1298_s19 = sphi %s1352_s19, %s2129_s19   ;;  %s1294_s18 = sphi %s1350_s18, %s2128_s18  }
   0x5   : > { %s30_s26 = sadd.s32 1, %s1310_s22  ;;  %s151_s27 = sadd.s32 1, %s1302_s20 }
   0x6   : > { %p32_p0 = scmp.ge.s32.totalorder %s30_s26, 2  ;;  %p161_p1 = scmp.ne.s32.totalorder %s1302_s20, %s1298_s19 }
   0x7   : > { %p162_p2 = scmp.eq.s32.totalorder %s1129_s24, 1  ;;  %p167_p3 = scmp.ne.s32.totalorder %s1298_s19, %s1294_s18 }
   0x8   : > { %s2134_s26 = smov (%p32_p0, %s30_s26), 0  ;;  %p168_p5 = scmp.eq.s32.totalorder %s1130_s25, 1 }
   0x9   : > { %p1390_p4 = por %p162_p2, %p161_p1  ;;  %s146_s29 = ssub.s32 %s1310_s22, %s2134_s26 }
   0xa   : > { %p1133_p6 = scmp.ge.s32.totalorder %s1314_s23, 1  ;;  %p149_p7 = scmp.eq.s32.totalorder %s146_s29, 0 }
   0xb   : > { %p1397_p8 = por %p168_p5, %p167_p3  ;;  %p211_p9 = scmp.lt.s32.totalorder %s1314_s23, 3 }
   0xc   : > { %s1403_s6 = scalar_select %p149_p7, %s1302_s20, %s151_s27  }
   0xd   : > { %p212_p10 = pnand %p1133_p6, %p211_p9 }
   0xf   : > { %215 = sbr.rel (%p212_p10) target bundleno = 420 (0x1a4), region = 40 }
  0x16   : > { %p244_p11 = scmp.lt.s32.totalorder %s1306_s21, 1  ;;  %v1316_v0 = vmov 0   ;;  %v283_v1 = vld [vmem:[%s2095_s2] sm:$0xff]  ;;  %v285_v2 = vld [vmem:[%s2095_s2 + $0x10] sm:$0xff]  ;;  %v284_v3 = vld [vmem:[%s2095_s2 + $0x8] sm:$0xff]  ;;  %vm419_vm0 = vcmask 261120  }
  0x17   : > { %476 = vmatprep.mubr.bf16.mxu0 %v1316_v0  ;;  %516 = vmatprep.mubr.bf16.mxu1 %v1316_v0  ;;  %v286_v4 = vld [vmem:[%s2095_s2 + $0x18] sm:$0xff]  ;;  %v287_v16 = vld [vmem:[%s2095_s2 + $0x20] sm:$0xff]  ;;  %v288_v17 = vld [vmem:[%s2095_s2 + $0x28] sm:$0xff]  ;;  %s240_s25 = sand.u32 1, %s1298_s19   ;;  %s1317_s13 = smov [#allocation2]  }
  0x18   : > { %s245_s7 = scalar_select %p244_p11, %s1306_s21, 1  ;;  %1222 = vset.pattern.permute.xlu0 %v1316_v0  ;;  %1223 = vset.pattern.permute.xlu1 %v1316_v0  ;;  %v1224_v19 = vld [vmem:[%s2094_s1] sm:$0xff]   ;;  %v289_v21 = vld [vmem:[%s2095_s2 + $0x30] sm:$0xff]  ;;  %v290_v22 = vld [vmem:[%s2095_s2 + $0x38] sm:$0xff] }
  0x19   : > { %301 = vperm.xlu0 %1222, %v283_v1   ;;  %311 = vperm.xlu1 %1223, %v285_v2   ;;  %v1225_v20 = vld [vmem:[%s2094_s1 + $0x20] sm:$0xff]   ;;  %v292_v24 = vld [vmem:[%s2095_s2 + $0x48] sm:$0xff]  ;;  %v293_v27 = vld [vmem:[%s2095_s2 + $0x50] sm:$0xff]  ;;  %s1915_s27 = sshll.u32 %s240_s25, 8  ;;  %s2047_s11 = scalar_lea.sflag [#allocation3], %s240_s25 }
  0x1a   : > { %s1158_s12 = sshll.u32 %s245_s7, 6  ;;  %v291_v23 = vld [vmem:[%s2095_s2 + $0x40] sm:$0xff]  ;;  %v1226_v25 = vld [vmem:[%s2094_s1 + $0x8] sm:$0xff]   ;;  %v294_v28 = vld [vmem:[%s2095_s2 + $0x58] sm:$0xff]  ;;  %s1950_s29 = scalar_lea.vmem [#allocation2], %s1915_s27 }
  0x1b   : > { %s251_s17 = scalar_lea.vmem %s2093_s0, %s1158_s12  ;;  %v1227_v26 = vld [vmem:[%s2094_s1 + $0x28] sm:$0xff]   ;;  %v295_v29 = vld [vmem:[%s2095_s2 + $0x60] sm:$0xff]  ;;  %v1228_v31 = vld [vmem:[%s2094_s1 + $0x10] sm:$0xff]   ;;  %s1159_s7 = sshll.u32 %s1306_s21, 12 }
  0x1c   : > { %v256_v5 = vld [vmem:[%s251_s17 + $0x8] sm:$0xff]  ;;  %v258_v6 = vld [vmem:[%s251_s17 + $0x18] sm:$0xff]  ;;  %v255_v7 = vld [vmem:[%s251_s17] sm:$0xff]  ;;  %s1050_s8 = sshll.u32 %s1950_s29, 4  ;;  %s2025_s10 = scalar_lea.hbm %s2098_s5, %s1159_s7  ;;  %s2027_s8 = int_to_ptr.vmem [resolvable:$true] %s1050_s8 }
  0x1d   : > { %v280_v8 = vpack.c.bf16 %v258_v6, %v256_v5  ;;  %v257_v9 = vld [vmem:[%s251_s17 + $0x10] sm:$0xff]  ;;  %v260_v10 = vld [vmem:[%s251_s17 + $0x28] sm:$0xff]  ;;  %v262_v11 = vld [vmem:[%s251_s17 + $0x38] sm:$0xff]  ;;  %306 = vperm.xlu0 %1222, %v284_v3   ;;  %316 = vperm.xlu1 %1223, %v286_v4   ;;  %s1236_s12 = scalar_lea.vmem %s2027_s8, 4096  ;;  %s1240_s14 = sshll.u32 %s1317_s13, 4  ;;  %s1241_s14 = int_to_ptr.vmem [resolvable:$false] %s1240_s14 }
  0x1e   : > { %v279_v12 = vpack.c.bf16 %v257_v9, %v255_v7  ;;  %v282_v13 = vpack.c.bf16 %v262_v11, %v260_v10  ;;  %v259_v14 = vld [vmem:[%s251_s17 + $0x20] sm:$0xff]  ;;  %v261_v15 = vld [vmem:[%s251_s17 + $0x30] sm:$0xff]  ;;  %v296_v30 = vld [vmem:[%s2095_s2 + $0x68] sm:$0xff]  ;;  %p1237_p12 = scmp.ne.s32.totalorder %s2027_s8, %s1236_s12  ;;  %s1242_s15 = scalar_lea.vmem %s1241_s14, 8192 }
  0x1f   : > { %444 = vmatprep.subr.bf16.mxu0 %v280_v8  ;;  %1160 = vmatprep.subr.bf16.mxu1 %v280_v8  ;;  %v281_v18 = vpack.c.bf16 %v261_v15, %v259_v14  ;;  %v1229_v32 = vld [vmem:[%s2094_s1 + $0x30] sm:$0xff]   ;;  %v298_v34 = vld [vmem:[%s2095_s2 + $0x78] sm:$0xff]  ;;  %v746_v35 = vld [vmem:[%s2096_s3] sm:$0xff]  ;;  %p1243_p1 = scmp.lt.s32.totalorder %s2027_s8, %s1241_s14  ;;  %p1244_p2 = scmp.lt.s32.totalorder %s1242_s15, %s1236_s12 }
  0x20   : > { %445 = vmatpush1.bf16.msra.mxu0 %v279_v12  ;;  %1162 = vmatpush1.bf16.msra.mxu1 %v279_v12  ;;  %v297_v33 = vld [vmem:[%s2095_s2 + $0x70] sm:$0xff]  ;;  %v747_v36 = vld [vmem:[%s2096_s3 + $0x8] sm:$0xff]  ;;  %v1230_v37 = vld [vmem:[%s2094_s1 + $0x18] sm:$0xff]   ;;  %p1238_p13 = pnand %p1237_p12, %p1390_p4 }
  0x21   : > { %446 = vmatprep.subr.bf16.mxu0 %v282_v13  ;;  %1161 = vmatprep.subr.bf16.mxu1 %v282_v13  ;;  %v1231_v38 = vld [vmem:[%s2094_s1 + $0x38] sm:$0xff]   ;;  %v748_v39 = vld [vmem:[%s2096_s3 + $0x10] sm:$0xff]  ;;  %v750_v41 = vld [vmem:[%s2096_s3 + $0x20] sm:$0xff]  ;;  %p1245_p3 = por %p1244_p2, %p1243_p1 }
  0x22   : > { %321 = vperm.xlu0 %1222, %v287_v16   ;;  %326 = vperm.xlu1 %1223, %v288_v17   ;;  %v749_v40 = vld [vmem:[%s2096_s3 + $0x18] sm:$0xff]  ;;  %v751_v42 = vld [vmem:[%s2096_s3 + $0x28] sm:$0xff]  ;;  %v752_v43 = vld [vmem:[%s2096_s3 + $0x30] sm:$0xff]  ;;  %p1239_p0 = pneg %p1238_p13 }
  0x23   : > { %v753_v44 = vld [vmem:[%s2096_s3 + $0x38] sm:$0xff]  ;;  %v754_v45 = vld [vmem:[%s2096_s3 + $0x40] sm:$0xff]  ;;  %v755_v46 = vld [vmem:[%s2096_s3 + $0x48] sm:$0xff] }
  0x24   : > { %447 = vmatpush1.bf16.msra.mxu0 %v281_v18  ;;  %1163 = vmatpush1.bf16.msra.mxu1 %v281_v18  ;;  %v756_v47 = vld [vmem:[%s2096_s3 + $0x50] sm:$0xff]  ;;  %v757_v48 = vld [vmem:[%s2096_s3 + $0x58] sm:$0xff]  ;;  %v758_v49 = vld [vmem:[%s2096_s3 + $0x60] sm:$0xff]  ;;  %p1246_p5 = pnand %p1245_p3, %p1239_p0 }
  0x25   : > { %v759_v50 = vld [vmem:[%s2096_s3 + $0x68] sm:$0xff]  ;;  %v760_v51 = vld [vmem:[%s2096_s3 + $0x70] sm:$0xff]  ;;  %v761_v52 = vld [vmem:[%s2096_s3 + $0x78] sm:$0xff] }
  0x26   : > { %331 = vperm.xlu0 %1222, %v289_v21   ;;  %336 = vperm.xlu1 %1223, %v290_v22   ;;  %v874_v53 = vld [vmem:[%s2097_s4] sm:$0xff]  ;;  %v875_v54 = vld [vmem:[%s2097_s4 + $0x8] sm:$0xff]  ;;  %v876_v55 = vld [vmem:[%s2097_s4 + $0x10] sm:$0xff] }
  0x27   : > { %1145 = vmatmul.mubr.msk.bf16.vlgmr.msra.gmra.mrb[0].mxu0 %vm419_vm0, %v1224_v19  ;;  %1149 = vmatmul.mubr.msk.bf16.vlgmr.msra.gmra.mrb[0].mxu1 %vm419_vm0, %v1225_v20  ;;  %v877_v56 = vld [vmem:[%s2097_s4 + $0x18] sm:$0xff]  ;;  %v878_v57 = vld [vmem:[%s2097_s4 + $0x20] sm:$0xff]  ;;  %v879_v58 = vld [vmem:[%s2097_s4 + $0x28] sm:$0xff] }
  0x28   : > { %486 = vmatprep.mubr.bf16.mxu0 %v1316_v0  ;;  %526 = vmatprep.mubr.bf16.mxu1 %v1316_v0  ;;  %v880_v59 = vld [vmem:[%s2097_s4 + $0x30] sm:$0xff]  ;;  %v881_v60 = vld [vmem:[%s2097_s4 + $0x38] sm:$0xff]  ;;  %v882_v61 = vld [vmem:[%s2097_s4 + $0x40] sm:$0xff] }
  0x29   : > { %v883_v62 = vld [vmem:[%s2097_s4 + $0x48] sm:$0xff]  ;;  %v884_v63 = vld [vmem:[%s2097_s4 + $0x50] sm:$0xff]  ;;  %v886_v1 = vld [vmem:[%s2097_s4 + $0x60] sm:$0xff] }
  0x2a   : > { %341 = vperm.xlu0 %1222, %v291_v23   ;;  %346 = vperm.xlu1 %1223, %v292_v24   ;;  %v887_v2 = vld [vmem:[%s2097_s4 + $0x68] sm:$0xff]  ;;  %v888_v3 = vld [vmem:[%s2097_s4 + $0x70] sm:$0xff]  ;;  %v889_v4 = vld [vmem:[%s2097_s4 + $0x78] sm:$0xff] }
  0x2e   : > { %351 = vperm.xlu0 %1222, %v293_v27   ;;  %356 = vperm.xlu1 %1223, %v294_v28  }
  0x2f   : > { %1146 = vmatmul.mubr.msk.bf16.gmra.mrb[4].mxu0 %vm419_vm0, %v1226_v25  ;;  %1150 = vmatmul.mubr.msk.bf16.gmra.mrb[4].mxu1 %vm419_vm0, %v1227_v26 }
  0x30   : > { %496 = vmatprep.mubr.bf16.mxu0 %v1316_v0  ;;  %536 = vmatprep.mubr.bf16.mxu1 %v1316_v0 }
  0x32   : > { %361 = vperm.xlu0 %1222, %v295_v29   ;;  %366 = vperm.xlu1 %1223, %v296_v30  }
  0x36   : > { %371 = vperm.xlu0 %1222, %v297_v33   ;;  %376 = vperm.xlu1 %1223, %v298_v34  }
  0x37   : > { %1147 = vmatmul.mubr.msk.bf16.gmra.mrb[8].mxu0 %vm419_vm0, %v1228_v31  ;;  %1151 = vmatmul.mubr.msk.bf16.gmra.mrb[8].mxu1 %vm419_vm0, %v1229_v32 }
  0x38   : > { %506 = vmatprep.mubr.bf16.mxu0 %v1316_v0  ;;  %546 = vmatprep.mubr.bf16.mxu1 %v1316_v0  ;;  %v885_v0 = vld [vmem:[%s2097_s4 + $0x58] sm:$0xff] }
  0x3a   : > { %764 = vperm.xlu0 %1222, %v746_v35   ;;  %769 = vperm.xlu1 %1223, %v747_v36  }
  0x3e   : > { %774 = vperm.xlu0 %1222, %v748_v39   ;;  %779 = vperm.xlu1 %1223, %v749_v40  }
  0x3f   : > { %1148 = vmatmul.mubr.msk.bf16.gmra.mrb[12].mxu0 %vm419_vm0, %v1230_v37  ;;  %1152 = vmatmul.mubr.msk.bf16.gmra.mrb[12].mxu1 %vm419_vm0, %v1231_v38 }
  0x42   : > { %784 = vperm.xlu0 %1222, %v750_v41   ;;  %789 = vperm.xlu1 %1223, %v751_v42  }
  0x46   : > { %794 = vperm.xlu0 %1222, %v752_v43   ;;  %799 = vperm.xlu1 %1223, %v753_v44  }
  0x4a   : > { %804 = vperm.xlu0 %1222, %v754_v45   ;;  %809 = vperm.xlu1 %1223, %v755_v46  }
  0x4e   : > { %814 = vperm.xlu0 %1222, %v756_v47   ;;  %819 = vperm.xlu1 %1223, %v757_v48  }
  0x52   : > { %824 = vperm.xlu0 %1222, %v758_v49   ;;  %829 = vperm.xlu1 %1223, %v759_v50  }
  0x56   : > { %834 = vperm.xlu0 %1222, %v760_v51   ;;  %839 = vperm.xlu1 %1223, %v761_v52  }
  0x5a   : > { %892 = vperm.xlu0 %1222, %v874_v53   ;;  %897 = vperm.xlu1 %1223, %v875_v54  }
  0x5e   : > { %902 = vperm.xlu0 %1222, %v876_v55   ;;  %907 = vperm.xlu1 %1223, %v877_v56  }
  0x62   : > { %912 = vperm.xlu0 %1222, %v878_v57   ;;  %917 = vperm.xlu1 %1223, %v879_v58  }
  0x66   : > { %922 = vperm.xlu0 %1222, %v880_v59   ;;  %927 = vperm.xlu1 %1223, %v881_v60  }
  0x6a   : > { %932 = vperm.xlu0 %1222, %v882_v61   ;;  %937 = vperm.xlu1 %1223, %v883_v62  }
  0x6e   : > { %942 = vperm.xlu0 %1222, %v884_v63   ;;  %947 = vperm.xlu1 %1223, %v885_v0  }
  0x72   : > { %952 = vperm.xlu0 %1222, %v886_v1   ;;  %957 = vperm.xlu1 %1223, %v887_v2  }
  0x76   : > { %962 = vperm.xlu0 %1222, %v888_v3   ;;  %967 = vperm.xlu1 %1223, %v889_v4  }
  0x98   : > { %v302_v5 = vpop.permute.xlu0 %301  ;;  %v312_v6 = vpop.permute.xlu1 %311 }
  0x9c   : > { %v307_v7 = vpop.permute.xlu0 %306  ;;  %v317_v8 = vpop.permute.xlu1 %316 }
  0xa1   : > { %v322_v23 = vpop.permute.xlu0 %321  ;;  %v327_v24 = vpop.permute.xlu1 %326 }
  0xa5   : > { %v332_v41 = vpop.permute.xlu0 %331  ;;  %v337_v42 = vpop.permute.xlu1 %336 }
  0xa9   : > { %v342_v58 = vpop.permute.xlu0 %341  ;;  %v347_v59 = vpop.permute.xlu1 %346 }
  0xfa   : > { %v478_v9 = vpop.f32.mrb[0].mxu0  ;;  %v1596_v10 = vpop.f32.mrb[0].mxu1 }
  0xfb   : > { %v480_v11 = vpop.f32.mrb[1].mxu0  ;;  %v1598_v12 = vpop.f32.mrb[1].mxu1  ;;  %v1602_v15 = vadd.f32 %v478_v9, %v302_v5 }
  0xfc   : > { %v482_v13 = vpop.f32.mrb[2].mxu0  ;;  %v1600_v14 = vpop.f32.mrb[2].mxu1  ;;  %v1608_v19 = vadd.f32 %v480_v11, %v302_v5 }
  0xfd   : > { %v1604_v16 = vadd.f32 %v482_v13, %v307_v7  ;;  %v484_v17 = vpop.f32.mrb[3].mxu0  ;;  %v1606_v18 = vpop.f32.mrb[3].mxu1 }
  0xfe   : > { %v1610_v20 = vadd.f32 %v484_v17, %v307_v7  ;;  %v352_v9 = vpop.permute.xlu0 %351  ;;  %v357_v11 = vpop.permute.xlu1 %356 }
  0xff   : > { %v557_v21 = vadd.f32 %v1604_v16, %v1602_v15 }
 0x100   : > { %v578_v22 = vadd.f32 %v1610_v20, %v1608_v19 }
 0x102   : > { %v488_v25 = vpop.f32.mrb[4].mxu0  ;;  %v528_v26 = vpop.f32.mrb[4].mxu1 }
 0x103   : > { %v1616_v27 = vadd.f32 %v488_v25, %v312_v6  ;;  %v490_v28 = vpop.f32.mrb[5].mxu0  ;;  %v530_v29 = vpop.f32.mrb[5].mxu1  ;;  %v523_v25 = vadd.f32 %v1600_v14, %v347_v59 }
 0x104   : > { %v1618_v30 = vadd.f32 %v490_v28, %v312_v6  ;;  %v492_v31 = vpop.f32.mrb[6].mxu0  ;;  %v532_v32 = vpop.f32.mrb[6].mxu1 }
 0x105   : > { %v558_v33 = vadd.f32 %v557_v21, %v1616_v27  ;;  %v1621_v34 = vadd.f32 %v492_v31, %v317_v8  ;;  %v494_v35 = vpop.f32.mrb[7].mxu0  ;;  %v534_v36 = vpop.f32.mrb[7].mxu1  ;;  %v1651_v21 = vadd.f32 %v1596_v10, %v342_v58  ;;  %v1661_v31 = vadd.f32 %v1606_v18, %v347_v59 }
 0x106   : > { %v579_v37 = vadd.f32 %v578_v22, %v1618_v30  ;;  %v1624_v38 = vadd.f32 %v494_v35, %v317_v8  ;;  %v529_v35 = vadd.f32 %v528_v26, %v352_v9  ;;  %v362_v10 = vpop.permute.xlu0 %361 }
 0x107   : > { %v559_v39 = vadd.f32 %v558_v33, %v1621_v34 }
 0x108   : > { %v580_v40 = vadd.f32 %v579_v37, %v1624_v38 }
 0x10a   : > { %v498_v43 = vpop.f32.mrb[8].mxu0  ;;  %v538_v44 = vpop.f32.mrb[8].mxu1 }
 0x10b   : > { %v1628_v45 = vadd.f32 %v498_v43, %v322_v23  ;;  %v500_v46 = vpop.f32.mrb[9].mxu0  ;;  %v540_v47 = vpop.f32.mrb[9].mxu1  ;;  %v1667_v43 = vadd.f32 %v534_v36, %v357_v11 }
 0x10c   : > { %v1630_v48 = vadd.f32 %v500_v46, %v322_v23  ;;  %v502_v49 = vpop.f32.mrb[10].mxu0  ;;  %v542_v50 = vpop.f32.mrb[10].mxu1  ;;  %v1655_v23 = vadd.f32 %v1598_v12, %v342_v58  ;;  %v539_v46 = vadd.f32 %v538_v44, %v362_v10  ;;  %v1670_v18 = vadd.f32 %v540_v47, %v362_v10 }
 0x10d   : > { %v560_v51 = vadd.f32 %v559_v39, %v1628_v45  ;;  %v1633_v52 = vadd.f32 %v502_v49, %v327_v24  ;;  %v504_v53 = vpop.f32.mrb[11].mxu0  ;;  %v544_v54 = vpop.f32.mrb[11].mxu1 }
 0x10e   : > { %v581_v55 = vadd.f32 %v580_v40, %v1630_v48  ;;  %v1636_v56 = vadd.f32 %v504_v53, %v327_v24  ;;  %v367_v39 = vpop.permute.xlu1 %366  ;;  %v1664_v40 = vadd.f32 %v530_v29, %v352_v9 }
 0x10f   : > { %v561_v57 = vadd.f32 %v560_v51, %v1633_v52  ;;  %v543_v26 = vadd.f32 %v542_v50, %v367_v39  ;;  %v1673_v29 = vadd.f32 %v544_v54, %v367_v39 }
 0x110   : > { %v582_v60 = vadd.f32 %v581_v55, %v1636_v56  ;;  %v372_v55 = vpop.permute.xlu0 %371 }
 0x112   : > { %v508_v61 = vpop.f32.mrb[12].mxu0  ;;  %v548_v62 = vpop.f32.mrb[12].mxu1 }
 0x113   : > { %v1640_v63 = vadd.f32 %v508_v61, %v332_v41  ;;  %v510_v0 = vpop.f32.mrb[13].mxu0  ;;  %v550_v1 = vpop.f32.mrb[13].mxu1 }
 0x114   : > { %v1642_v2 = vadd.f32 %v510_v0, %v332_v41  ;;  %v512_v3 = vpop.f32.mrb[14].mxu0  ;;  %v552_v4 = vpop.f32.mrb[14].mxu1  ;;  %v533_v41 = vadd.f32 %v532_v32, %v357_v11  ;;  %v549_v32 = vadd.f32 %v548_v62, %v372_v55  ;;  %v1676_v36 = vadd.f32 %v550_v1, %v372_v55 }
 0x115   : > { %v562_v5 = vadd.f32 %v561_v57, %v1640_v63  ;;  %v1645_v6 = vadd.f32 %v512_v3, %v337_v42  ;;  %v514_v7 = vpop.f32.mrb[15].mxu0  ;;  %v554_v8 = vpop.f32.mrb[15].mxu1 }
 0x116   : > { %v583_v13 = vadd.f32 %v582_v60, %v1642_v2  ;;  %v1648_v17 = vadd.f32 %v514_v7, %v337_v42  ;;  %v377_v57 = vpop.permute.xlu1 %376  ;;  %v1682_v3 = vpop.permute.xlu0 %764 }
 0x117   : > { %v563_v22 = vadd.f32 %v562_v5, %v1645_v6  ;;  %v553_v44 = vadd.f32 %v552_v4, %v377_v57  ;;  %v1679_v47 = vadd.f32 %v554_v8, %v377_v57 }
 0x118   : > { %v584_v24 = vadd.f32 %v583_v13, %v1648_v17 }
 0x119   : > { %v564_v28 = vadd.f32 %v563_v22, %v1651_v21 }
 0x11a   : > { %v585_v33 = vadd.f32 %v584_v24, %v1655_v23  ;;  %v1684_v5 = vpop.permute.xlu1 %769  ;;  %v1687_v13 = vpop.permute.xlu0 %774 }
 0x11b   : > { %v565_v37 = vadd.f32 %v564_v28, %v523_v25 }
 0x11c   : > { %v586_v12 = vadd.f32 %v585_v33, %v1661_v31 }
 0x11d   : > { %v566_v42 = vadd.f32 %v565_v37, %v529_v35 }
 0x11e   : > { %v587_v14 = vadd.f32 %v586_v12, %v1664_v40  ;;  %v1689_v4 = vpop.permute.xlu1 %779  ;;  %v1691_v10 = vpop.permute.xlu0 %784 }
 0x11f   : > { %v567_v49 = vadd.f32 %v566_v42, %v533_v41 }
 0x120   : > { %v588_v51 = vadd.f32 %v587_v14, %v1667_v43 }
 0x121   : > { %v568_v53 = vadd.f32 %v567_v49, %v539_v46 }
 0x122   : > { %v589_v58 = vadd.f32 %v588_v51, %v1670_v18  ;;  %v1693_v39 = vpop.permute.xlu1 %789 }
 0x123   : > { %v569_v59 = vadd.f32 %v568_v53, %v543_v26 }
 0x124   : > { %v590_v60 = vadd.f32 %v589_v58, %v1673_v29 }
 0x125   : > { %v570_v61 = vadd.f32 %v569_v59, %v549_v32 }
 0x126   : > { %v591_v0 = vadd.f32 %v590_v60, %v1676_v36  ;;  %v1730_v60 = vpop.permute.xlu1 %799 }
 0x127   : > { %v571_v50 = vadd.f32 %v570_v61, %v553_v44 }
 0x128   : > { %v592_v54 = vadd.f32 %v591_v0, %v1679_v47 }
 0x129   : > { %v572_v7 = vrot.slane %v571_v50, 4 }
 0x12a   : > { %v593_v62 = vrot.slane %v592_v54, 4 }
 0x12b   : > { %v573_v9 = vadd.f32 %v572_v7, %v571_v50 }
 0x12c   : > { %v594_v1 = vadd.f32 %v593_v62, %v592_v54  ;;  %v1759_v54 = vpop.permute.xlu1 %809 }
 0x12d   : > { %v574_v11 = vrot.slane %v573_v9, 2 }
 0x12e   : > { %v595_v8 = vrot.slane %v594_v1, 2 }
 0x12f   : > { %v575_v22 = vadd.f32 %v574_v11, %v573_v9 }
 0x130   : > { %v596_v24 = vadd.f32 %v595_v8, %v594_v1 }
 0x131   : > { %v576_v28 = vrot.slane %v575_v22, 1 }
 0x132   : > { %v597_v33 = vrot.slane %v596_v24, 1 }
 0x133   : > { %v577_v37 = vadd.f32 %v576_v28, %v575_v22 }
 0x134   : > { %v598_v42 = vadd.f32 %v597_v33, %v596_v24  ;;  %v1810_v24 = vpop.permute.xlu1 %819 }
 0x135   : > { %v600_v12 = vmul.f32 0.0078125, %v577_v37 }
 0x137   : > { %v1696_v14 = vsub.f32 %v1602_v15, %v600_v12  ;;  %v1699_v49 = vsub.f32 %v1604_v16, %v600_v12  ;;  %v1702_v51 = vsub.f32 %v1616_v27, %v600_v12  ;;  %v1705_v53 = vsub.f32 %v1621_v34, %v600_v12 }
 0x138   : > { %v1708_v55 = vsub.f32 %v1628_v45, %v600_v12  ;;  %v1711_v57 = vsub.f32 %v1633_v52, %v600_v12  ;;  %v1714_v58 = vsub.f32 %v1640_v63, %v600_v12  ;;  %v1717_v15 = vsub.f32 %v1645_v6, %v600_v12  ;;  %v1728_v45 = vpop.permute.xlu0 %794 }
 0x139   : > { %v1720_v16 = vsub.f32 %v1651_v21, %v600_v12  ;;  %v1722_v27 = vsub.f32 %v523_v25, %v600_v12  ;;  %v1724_v59 = vsub.f32 %v529_v35, %v600_v12  ;;  %v1726_v34 = vsub.f32 %v533_v41, %v600_v12 }
 0x13a   : > { %v1732_v52 = vsub.f32 %v539_v46, %v600_v12  ;;  %v1734_v63 = vsub.f32 %v543_v26, %v600_v12  ;;  %v1736_v61 = vsub.f32 %v549_v32, %v600_v12  ;;  %v1738_v6 = vsub.f32 %v553_v44, %v600_v12 }
 0x13b   : > { %v634_v21 = vmul.f32 %v1696_v14, %v1696_v14  ;;  %v636_v25 = vmul.f32 %v1699_v49, %v1699_v49  ;;  %v601_v35 = vmul.f32 0.0078125, %v598_v42  ;;  %v638_v41 = vmul.f32 %v1702_v51, %v1702_v51 }
 0x13c   : > { %v640_v46 = vmul.f32 %v1705_v53, %v1705_v53  ;;  %v1757_v50 = vpop.permute.xlu0 %804  ;;  %v648_v37 = vmul.f32 %v1717_v15, %v1717_v15 }
 0x13d   : > { %v666_v0 = vadd.f32 %v636_v25, %v634_v21  ;;  %v1749_v26 = vsub.f32 %v1608_v19, %v601_v35  ;;  %v1752_v32 = vsub.f32 %v1610_v20, %v601_v35  ;;  %v1755_v44 = vsub.f32 %v1618_v30, %v601_v35 }
 0x13e   : > { %v1762_v7 = vsub.f32 %v1624_v38, %v601_v35  ;;  %v1765_v62 = vsub.f32 %v1630_v48, %v601_v35  ;;  %v1768_v9 = vsub.f32 %v1636_v56, %v601_v35  ;;  %v1771_v19 = vsub.f32 %v1642_v2, %v601_v35 }
 0x13f   : > { %v667_v20 = vadd.f32 %v666_v0, %v638_v41  ;;  %v1774_v30 = vsub.f32 %v1648_v17, %v601_v35  ;;  %v1777_v1 = vsub.f32 %v1655_v23, %v601_v35  ;;  %v1780_v11 = vsub.f32 %v1661_v31, %v601_v35 }
 0x140   : > { %v1783_v38 = vsub.f32 %v1664_v40, %v601_v35  ;;  %v1786_v48 = vsub.f32 %v1667_v43, %v601_v35  ;;  %v1789_v56 = vsub.f32 %v1670_v18, %v601_v35  ;;  %v1792_v2 = vsub.f32 %v1673_v29, %v601_v35  ;;  %v1808_v22 = vpop.permute.xlu0 %814 }
 0x141   : > { %2110 = vst [vmem:[#allocation5_spill] sm:$0xff] %v1774_v30  ;;  %2111 = vst [vmem:[#allocation6_spill] sm:$0xff] %v1777_v1  ;;  %v642_v17 = vmul.f32 %v1708_v55, %v1708_v55  ;;  %v668_v23 = vadd.f32 %v667_v20, %v640_v46  ;;  %v1797_v8 = vsub.f32 %v1676_v36, %v601_v35  ;;  %v1824_v46 = vpop.permute.xlu1 %829 }
 0x142   : > { %2112 = vst [vmem:[#allocation7_spill] sm:$0xff] %v1780_v11  ;;  %2113 = vst [vmem:[#allocation8_spill] sm:$0xff] %v1783_v38  ;;  %v1800_v31 = vsub.f32 %v1679_v47, %v601_v35  ;;  %v635_v40 = vmul.f32 %v1749_v26, %v1749_v26  ;;  %v637_v43 = vmul.f32 %v1752_v32, %v1752_v32 }
 0x143   : > { %2114 = vst [vmem:[#allocation9_spill] sm:$0xff] %v1786_v48  ;;  %2115 = vst [vmem:[#allocation10_spill] sm:$0xff] %v1789_v56  ;;  %v644_v18 = vmul.f32 %v1711_v57, %v1711_v57  ;;  %v669_v29 = vadd.f32 %v668_v23, %v642_v17  ;;  %v646_v36 = vmul.f32 %v1714_v58, %v1714_v58 }
 0x144   : > { %2116 = vst [vmem:[#allocation11_spill] sm:$0xff] %v1792_v2  ;;  %2117 = vst [vmem:[#allocation12_spill] sm:$0xff] %v1797_v8  ;;  %v639_v47 = vmul.f32 %v1755_v44, %v1755_v44  ;;  %v687_v33 = vadd.f32 %v637_v43, %v635_v40  ;;  %v641_v42 = vmul.f32 %v1762_v7, %v1762_v7  ;;  %v1822_v41 = vpop.permute.xlu0 %824 }
 0x145   : > { %v670_v28 = vadd.f32 %v669_v29, %v644_v18  ;;  %v650_v25 = vmul.f32 %v1720_v16, %v1720_v16  ;;  %v643_v0 = vmul.f32 %v1765_v62, %v1765_v62  ;;  %v652_v17 = vmul.f32 %v1722_v27, %v1722_v27 }
 0x146   : > { %v688_v21 = vadd.f32 %v687_v33, %v639_v47  ;;  %v645_v40 = vmul.f32 %v1768_v9, %v1768_v9  ;;  %v654_v18 = vmul.f32 %v1724_v59, %v1724_v59  ;;  %v656_v47 = vmul.f32 %v1726_v34, %v1726_v34 }
 0x147   : > { %v671_v12 = vadd.f32 %v670_v28, %v646_v36  ;;  %v647_v36 = vmul.f32 %v1771_v19, %v1771_v19 }
 0x148   : > { %v689_v20 = vadd.f32 %v688_v21, %v641_v42  ;;  %v649_v42 = vmul.f32 %v1774_v30, %v1774_v30 }
 0x149   : > { %v672_v35 = vadd.f32 %v671_v12, %v648_v37  ;;  %v1838_v37 = vpop.permute.xlu0 %834  ;;  %v1840_v12 = vpop.permute.xlu1 %839 }
 0x14a   : > { %v690_v43 = vadd.f32 %v689_v20, %v643_v0  ;;  %2118 = vst [vmem:[#allocation13_spill] sm:$0xff] %v1838_v37  ;;  %v651_v0 = vmul.f32 %v1777_v1, %v1777_v1 }
 0x14b   : > { %v673_v23 = vadd.f32 %v672_v35, %v650_v25  ;;  %v658_v25 = vmul.f32 %v1732_v52, %v1732_v52 }
 0x14c   : > { %v691_v28 = vadd.f32 %v690_v43, %v645_v40  ;;  %v653_v40 = vmul.f32 %v1780_v11, %v1780_v11 }
 0x14d   : > { %v674_v29 = vadd.f32 %v673_v23, %v652_v17  ;;  %v660_v17 = vmul.f32 %v1734_v63, %v1734_v63 }
 0x14e   : > { %v692_v21 = vadd.f32 %v691_v28, %v647_v36  ;;  %v1854_v36 = vpop.permute.xlu0 %892  ;;  %v1856_v28 = vpop.permute.xlu1 %897 }
 0x14f   : > { %v675_v33 = vadd.f32 %v674_v29, %v654_v18  ;;  %v662_v18 = vmul.f32 %v1736_v61, %v1736_v61 }
 0x150   : > { %v693_v20 = vadd.f32 %v692_v21, %v649_v42  ;;  %v664_v42 = vmul.f32 %v1738_v6, %v1738_v6 }
 0x151   : > { %v676_v35 = vadd.f32 %v675_v33, %v656_v47  ;;  %v655_v47 = vmul.f32 %v1783_v38, %v1783_v38 }
 0x152   : > { %v694_v43 = vadd.f32 %v693_v20, %v651_v0  ;;  %v659_v20 = vmul.f32 %v1789_v56, %v1789_v56  ;;  %v1866_v11 = vpop.permute.xlu0 %902  ;;  %v1868_v1 = vpop.permute.xlu1 %907 }
 0x153   : > { %v677_v23 = vadd.f32 %v676_v35, %v658_v25  ;;  %v657_v25 = vmul.f32 %v1786_v48, %v1786_v48 }
 0x154   : > { %v695_v33 = vadd.f32 %v694_v43, %v653_v40  ;;  %v661_v40 = vmul.f32 %v1792_v2, %v1792_v2 }
 0x155   : > { %v678_v29 = vadd.f32 %v677_v23, %v660_v17 }
 0x156   : > { %v696_v35 = vadd.f32 %v695_v33, %v655_v47  ;;  %v665_v33 = vmul.f32 %v1800_v31, %v1800_v31 }
 0x157   : > { %v679_v21 = vadd.f32 %v678_v29, %v662_v18  ;;  %v663_v18 = vmul.f32 %v1797_v8, %v1797_v8 }
 0x158   : > { %v697_v17 = vadd.f32 %v696_v35, %v657_v25  ;;  %v1876_v25 = vpop.permute.xlu0 %912  ;;  %v1878_v35 = vpop.permute.xlu1 %917 }
 0x159   : > { %v680_v0 = vadd.f32 %v679_v21, %v664_v42 }
 0x15a   : > { %v698_v43 = vadd.f32 %v697_v17, %v659_v20 }
 0x15b   : > { %v681_v23 = vrot.slane %v680_v0, 4 }
 0x15c   : > { %v699_v29 = vadd.f32 %v698_v43, %v661_v40  ;;  %v1880_v17 = vpop.permute.xlu0 %922 }
 0x15d   : > { %v682_v38 = vadd.f32 %v681_v23, %v680_v0  ;;  %v1882_v23 = vpop.permute.xlu1 %927 }
 0x15e   : > { %v700_v42 = vadd.f32 %v699_v29, %v663_v18 }
 0x15f   : > { %v683_v47 = vrot.slane %v682_v38, 2 }
 0x160   : > { %v701_v56 = vadd.f32 %v700_v42, %v665_v33  ;;  %v1884_v18 = vpop.permute.xlu0 %932 }
 0x161   : > { %v684_v21 = vadd.f32 %v683_v47, %v682_v38  ;;  %v1886_v29 = vpop.permute.xlu1 %937 }
 0x162   : > { %v702_v30 = vrot.slane %v701_v56, 4 }
 0x163   : > { %v685_v48 = vrot.slane %v684_v21, 1 }
 0x164   : > { %v703_v20 = vadd.f32 %v702_v30, %v701_v56 }
 0x165   : > { %v686_v2 = vadd.f32 %v685_v48, %v684_v21  ;;  %v1888_v48 = vpop.permute.xlu0 %942  ;;  %v1890_v30 = vpop.permute.xlu1 %947 }
 0x166   : > { %v704_v40 = vrot.slane %v703_v20, 2 }
 0x167   : > { %v708_v0 = vmul.f32 0.0078125, %v686_v2 }
 0x168   : > { %v705_v8 = vadd.f32 %v704_v40, %v703_v20 }
 0x169   : > { %v710_v43 = vadd.f32 1e-05, %v708_v0 }
 0x16a   : > { %v706_v38 = vrot.slane %v705_v8, 1 }
 0x16b   : > { %1232 = vrsqrt.f32 %v710_v43 }
 0x16c   : > { %v707_v47 = vadd.f32 %v706_v38, %v705_v8 }
 0x16e   : > { %v709_v33 = vmul.f32 0.0078125, %v707_v47 }
 0x170   : > { %v711_v42 = vadd.f32 1e-05, %v709_v33 }
 0x172   : > { %1234 = vrsqrt.f32 %v711_v42  ;;  %v1909_v42 = vpop.permute.xlu0 %952 }
 0x175   : > { %v1233_v56 = vpop.eup %1232 }
 0x176   : > { %v714_v2 = vmul.f32 %v1233_v56, %v1696_v14  ;;  %v716_v21 = vmul.f32 %v1233_v56, %v1699_v49  ;;  %v718_v20 = vmul.f32 %v1233_v56, %v1702_v51  ;;  %v720_v0 = vmul.f32 %v1233_v56, %v1705_v53 }
 0x177   : > { %v722_v8 = vmul.f32 %v1233_v56, %v1708_v55  ;;  %v724_v40 = vmul.f32 %v1233_v56, %v1711_v57  ;;  %v726_v43 = vmul.f32 %v1233_v56, %v1714_v58  ;;  %v728_v38 = vmul.f32 %v1233_v56, %v1717_v15  ;;  %v1911_v58 = vpop.permute.xlu1 %957 }
 0x178   : > { %v730_v47 = vmul.f32 %v1233_v56, %v1720_v16  ;;  %v732_v14 = vmul.f32 %v1233_v56, %v1722_v27  ;;  %v734_v49 = vmul.f32 %v1233_v56, %v1724_v59  ;;  %v736_v51 = vmul.f32 %v1233_v56, %v1726_v34 }
 0x179   : > { %v738_v53 = vmul.f32 %v1233_v56, %v1732_v52  ;;  %v740_v33 = vmul.f32 %v1233_v56, %v1734_v63  ;;  %v742_v55 = vmul.f32 %v1233_v56, %v1736_v61  ;;  %v744_v57 = vmul.f32 %v1233_v56, %v1738_v6 }
 0x17a   : > { %v842_v15 = vmul.f32 %v1682_v3, %v714_v2  ;;  %v844_v16 = vmul.f32 %v1684_v5, %v716_v21  ;;  %v846_v27 = vmul.f32 %v1687_v13, %v718_v20  ;;  %v848_v59 = vmul.f32 %v1689_v4, %v720_v0 }
 0x17b   : > { %v850_v34 = vmul.f32 %v1691_v10, %v722_v8  ;;  %v852_v52 = vmul.f32 %v1693_v39, %v724_v40  ;;  %v854_v63 = vmul.f32 %v1728_v45, %v726_v43  ;;  %v856_v61 = vmul.f32 %v1730_v60, %v728_v38 }
 0x17c   : > { %v858_v6 = vmul.f32 %v1757_v50, %v730_v47  ;;  %v860_v56 = vmul.f32 %v1759_v54, %v732_v14  ;;  %v862_v2 = vmul.f32 %v1808_v22, %v734_v49  ;;  %v864_v21 = vmul.f32 %v1810_v24, %v736_v51  ;;  %v1235_v49 = vpop.eup %1234 }
 0x17d   : > { %v866_v20 = vmul.f32 %v1822_v41, %v738_v53  ;;  %v868_v0 = vmul.f32 %v1824_v46, %v740_v33  ;;  %v870_v8 = vmul.f32 %v1838_v37, %v742_v55  ;;  %v872_v40 = vmul.f32 %v1840_v12, %v744_v57  ;;  %v1941_v37 = vpop.permute.xlu0 %962  ;;  %v1943_v57 = vpop.permute.xlu1 %967 }
 0x17e   : > { %v970_v43 = vadd.f32 %v1854_v36, %v842_v15  ;;  %v972_v38 = vadd.f32 %v1856_v28, %v844_v16  ;;  %v974_v47 = vadd.f32 %v1866_v11, %v846_v27  ;;  %v976_v14 = vadd.f32 %v1868_v1, %v848_v59 }
 0x17f   : > { %v978_v51 = vadd.f32 %v1876_v25, %v850_v34  ;;  %v980_v53 = vadd.f32 %v1878_v35, %v852_v52  ;;  %v982_v33 = vadd.f32 %v1880_v17, %v854_v63  ;;  %v984_v55 = vadd.f32 %v1882_v23, %v856_v61 }
 0x180   : > { %v986_v15 = vadd.f32 %v1884_v18, %v858_v6  ;;  %v988_v16 = vadd.f32 %v1886_v29, %v860_v56  ;;  %v990_v27 = vadd.f32 %v1888_v48, %v862_v2  ;;  %v992_v59 = vadd.f32 %v1890_v30, %v864_v21  ;;  %1002 = vst [vmem:[%s1950_s29] sm:$0xff] %v970_v43 }
 0x181   : > { %1004 = vst [vmem:[%s1950_s29 + $0x10] sm:$0xff] %v972_v38  ;;  %1006 = vst [vmem:[%s1950_s29 + $0x20] sm:$0xff] %v974_v47  ;;  %v994_v34 = vadd.f32 %v1909_v42, %v866_v20  ;;  %v996_v52 = vadd.f32 %v1911_v58, %v868_v0  ;;  %v998_v63 = vadd.f32 %v1941_v37, %v870_v8  ;;  %v2120_v38 = vld [vmem:[#allocation6_spill] sm:$0xff]  ;;  %v2121_v47 = vld [vmem:[#allocation7_spill] sm:$0xff] }
 0x182   : > { %1008 = vst [vmem:[%s1950_s29 + $0x30] sm:$0xff] %v976_v14  ;;  %v1000_v61 = vadd.f32 %v1943_v57, %v872_v40  ;;  %1010 = vst [vmem:[%s1950_s29 + $0x40] sm:$0xff] %v978_v51  ;;  %v715_v6 = vmul.f32 %v1235_v49, %v1749_v26  ;;  %v717_v56 = vmul.f32 %v1235_v49, %v1752_v32  ;;  %v2119_v40 = vld [vmem:[#allocation5_spill] sm:$0xff]  ;;  %v2122_v14 = vld [vmem:[#allocation8_spill] sm:$0xff] }
 0x183   : > { %1012 = vst [vmem:[%s1950_s29 + $0x50] sm:$0xff] %v980_v53  ;;  %1014 = vst [vmem:[%s1950_s29 + $0x60] sm:$0xff] %v982_v33  ;;  %v719_v2 = vmul.f32 %v1235_v49, %v1755_v44  ;;  %v721_v21 = vmul.f32 %v1235_v49, %v1762_v7  ;;  %v723_v20 = vmul.f32 %v1235_v49, %v1765_v62  ;;  %v2123_v51 = vld [vmem:[#allocation9_spill] sm:$0xff]  ;;  %v2124_v53 = vld [vmem:[#allocation10_spill] sm:$0xff] }
 0x184   : > { %1016 = vst [vmem:[%s1950_s29 + $0x70] sm:$0xff] %v984_v55  ;;  %1018 = vst [vmem:[%s1950_s29 + $0x80] sm:$0xff] %v986_v15  ;;  %v725_v0 = vmul.f32 %v1235_v49, %v1768_v9  ;;  %v727_v8 = vmul.f32 %v1235_v49, %v1771_v19  ;;  %v729_v43 = vmul.f32 %v1235_v49, %v2119_v40  ;;  %v2125_v55 = vld [vmem:[#allocation11_spill] sm:$0xff] }
 0x185   : > { %1020 = vst [vmem:[%s1950_s29 + $0x90] sm:$0xff] %v988_v16  ;;  %1022 = vst [vmem:[%s1950_s29 + $0xa0] sm:$0xff] %v990_v27  ;;  %v731_v26 = vmul.f32 %v1235_v49, %v2120_v38  ;;  %v733_v32 = vmul.f32 %v1235_v49, %v2121_v47  ;;  %v735_v44 = vmul.f32 %v1235_v49, %v2122_v14  ;;  %v2126_v16 = vld [vmem:[#allocation12_spill] sm:$0xff] }
 0x186   : > { %1024 = vst [vmem:[%s1950_s29 + $0xb0] sm:$0xff] %v992_v59  ;;  %1026 = vst [vmem:[%s1950_s29 + $0xc0] sm:$0xff] %v994_v34  ;;  %v737_v7 = vmul.f32 %v1235_v49, %v2123_v51  ;;  %v739_v33 = vmul.f32 %v1235_v49, %v2124_v53  ;;  %v741_v15 = vmul.f32 %v1235_v49, %v2125_v55 }
 0x187   : > { %1028 = vst [vmem:[%s1950_s29 + $0xd0] sm:$0xff] %v996_v52  ;;  %1030 = vst [vmem:[%s1950_s29 + $0xe0] sm:$0xff] %v998_v63  ;;  %v743_v62 = vmul.f32 %v1235_v49, %v2126_v16  ;;  %v745_v9 = vmul.f32 %v1235_v49, %v1800_v31  ;;  %v843_v19 = vmul.f32 %v1682_v3, %v715_v6  ;;  %v2127_v6 = vld [vmem:[#allocation13_spill] sm:$0xff] }
 0x188   : > { %1032 = vst [vmem:[%s1950_s29 + $0xf0] sm:$0xff] %v1000_v61  ;;  %v845_v27 = vmul.f32 %v1684_v5, %v717_v56  ;;  %v847_v59 = vmul.f32 %v1687_v13, %v719_v2  ;;  %v849_v34 = vmul.f32 %v1689_v4, %v721_v21  ;;  %v851_v52 = vmul.f32 %v1691_v10, %v723_v20 }
 0x189   : > { %v853_v63 = vmul.f32 %v1693_v39, %v725_v0  ;;  %v855_v61 = vmul.f32 %v1728_v45, %v727_v8  ;;  %v857_v40 = vmul.f32 %v1730_v60, %v729_v43  ;;  %v859_v31 = vmul.f32 %v1757_v50, %v731_v26 }
 0x18a   : > { %v861_v3 = vmul.f32 %v1759_v54, %v733_v32  ;;  %v863_v49 = vmul.f32 %v1808_v22, %v735_v44  ;;  %v865_v5 = vmul.f32 %v1810_v24, %v737_v7  ;;  %v867_v13 = vmul.f32 %v1822_v41, %v739_v33 }
 0x18b   : > { %v869_v4 = vmul.f32 %v1824_v46, %v741_v15  ;;  %v871_v10 = vmul.f32 %v2127_v6, %v743_v62  ;;  %v873_v39 = vmul.f32 %v1840_v12, %v745_v9  ;;  %v971_v45 = vadd.f32 %v1854_v36, %v843_v19 }
 0x18c   : > { %v973_v60 = vadd.f32 %v1856_v28, %v845_v27  ;;  %v975_v50 = vadd.f32 %v1866_v11, %v847_v59  ;;  %v977_v54 = vadd.f32 %v1868_v1, %v849_v34  ;;  %v979_v22 = vadd.f32 %v1876_v25, %v851_v52 }
 0x18d   : > { %v981_v24 = vadd.f32 %v1878_v35, %v853_v63  ;;  %v983_v41 = vadd.f32 %v1880_v17, %v855_v61  ;;  %v985_v46 = vadd.f32 %v1882_v23, %v857_v40  ;;  %v987_v12 = vadd.f32 %v1884_v18, %v859_v31  ;;  %1003 = vst [vmem:[%s1950_s29 + $0x8] sm:$0xff] %v971_v45 }
 0x18e   : > { %v989_v36 = vadd.f32 %v1886_v29, %v861_v3  ;;  %v991_v11 = vadd.f32 %v1888_v48, %v863_v49  ;;  %v993_v1 = vadd.f32 %v1890_v30, %v865_v5  ;;  %1005 = vst [vmem:[%s1950_s29 + $0x18] sm:$0xff] %v973_v60  ;;  %1007 = vst [vmem:[%s1950_s29 + $0x28] sm:$0xff] %v975_v50 }
 0x18f   : > { %1009 = vst [vmem:[%s1950_s29 + $0x38] sm:$0xff] %v977_v54  ;;  %v995_v28 = vadd.f32 %v1909_v42, %v867_v13  ;;  %v997_v25 = vadd.f32 %v1911_v58, %v869_v4  ;;  %v999_v35 = vadd.f32 %v1941_v37, %v871_v10  ;;  %v1001_v17 = vadd.f32 %v1943_v57, %v873_v39 }
 0x190   : > { %1011 = vst [vmem:[%s1950_s29 + $0x48] sm:$0xff] %v979_v22  ;;  %1013 = vst [vmem:[%s1950_s29 + $0x58] sm:$0xff] %v981_v24 }
 0x191   : > { %1015 = vst [vmem:[%s1950_s29 + $0x68] sm:$0xff] %v983_v41  ;;  %1017 = vst [vmem:[%s1950_s29 + $0x78] sm:$0xff] %v985_v46 }
 0x192   : > { %1019 = vst [vmem:[%s1950_s29 + $0x88] sm:$0xff] %v987_v12  ;;  %1021 = vst [vmem:[%s1950_s29 + $0x98] sm:$0xff] %v989_v36 }
 0x193   : > { %1023 = vst [vmem:[%s1950_s29 + $0xa8] sm:$0xff] %v991_v11  ;;  %1025 = vst [vmem:[%s1950_s29 + $0xb8] sm:$0xff] %v993_v1 }
 0x194   : > { %1027 = vst [vmem:[%s1950_s29 + $0xc8] sm:$0xff] %v995_v28  ;;  %1029 = vst [vmem:[%s1950_s29 + $0xd8] sm:$0xff] %v997_v25 }
 0x195   : > { %1031 = vst [vmem:[%s1950_s29 + $0xe8] sm:$0xff] %v999_v35  ;;  %1033 = vst [vmem:[%s1950_s29 + $0xf8] sm:$0xff] %v1001_v17 }
 0x196   : > { %1249 = shalt.err (!%p1246_p5)
}
 0x197   : > { %s1250_s16 = scalar_lea.hbm %s2025_s10, 4096  ;;  %s1254_s25 = scalar_lea.hbm %s2098_s5, 8192 }
 0x198   : > { %p1251_p6 = scmp.ne.s32.totalorder %s2025_s10, %s1250_s16  ;;  %p1255_p10 = scmp.lt.u32.totalorder %s2025_s10, %s2098_s5 }
 0x199   : > { %p1256_p11 = scmp.lt.u32.totalorder %s1254_s25, %s1250_s16  ;;  %p1258_p13 = scmp.lt.u32.totalorder %s1250_s16, %s2025_s10 }
 0x19a   : > { %p1252_p7 = pnand %p1251_p6, %p1390_p4 }
 0x19b   : > { %p1257_p12 = por %p1256_p11, %p1255_p10 }
 0x19c   : > { %p1253_p9 = pneg %p1252_p7 }
 0x19d   : > { %p1259_p0 = por %p1258_p13, %p1257_p12 }
 0x19f   : > { %p1260_p1 = pnand %p1259_p0, %p1253_p9 }
 0x1a1   : > { %1263 = shalt.err (!%p1260_p1)
}
 0x1a2   : > { %s1318_s7 = smov 256   ;;  %s1319_s21 = smov 16  }
 0x1a3   : > { %1164 = dma.vmem_to_hbm [thread:$0]  (%p1390_p4), %s2027_s8, 4096, %s2025_s10, %s2047_s11, %s1318_s7, %s1318_s7, %s1319_s21  }
 0x1a4 PF: > { %p1170_p2 = scmp.ge.s32.totalorder %s1314_s23, 2  ;;  %s1065_s9 = sand.u32 1, %s1294_s18  }
 0x1a5   : > { %s1066_s12 = scalar_lea.sflag [#allocation3], %s1065_s9 }
 0x1a6   : > { %p1167_p3 = pnand %p1170_p2, %p1397_p8 }
 0x1a8   : > { %1289 = dma.done.wait (!%p1167_p3), %s1066_s12, 4096  }
 0x1a9   : > { %1291 = vsyncadd (!%p1167_p3), %s1066_s12, 4294963200  ;;  %s18_s23 = sadd.s32 1, %s1314_s23   ;;  %s2128_s18 = smov %s1298_s19 }
 0x1aa   : > { %p15_p5 = scmp.ge.s32.totalorder %s18_s23, 4   ;;  %s2129_s19 = smov %s1302_s20 }
 0x1ab   : > { %s2130_s20 = smov %s1403_s6  ;;  %s2131_s21 = smov %s1310_s22 }
 0x1ac   : > { %s2132_s22 = smov %s2134_s26  ;;  %17 = sbr.rel (!%p15_p5) target bundleno = 4 (0x4), region = 75 }
 0x1b3   :  { %1071 = vsyncpa [#allocation3], 1 }
 0x1b4   :  { %1073 = vsyncpa [#allocation3 + $0x1], 1 }

</bundles_post_ra>
